<compile_context>
chip_gen: v6e
topology: v6e:2x2x1
jax: 0.10.0
libtpu: 0.0.40
codegen_flags: <defaults>
</compile_context>

<pallas_src>
import jax
import jax.numpy as jnp
from jax.experimental import pallas as pl
from jax.experimental.pallas import tpu as pltpu


def _sublane_multiple(dtype) -> int:
    """Minimum second-to-last block dim for this dtype: 8 f32, 16 bf16, 32 int8."""
    itemsize = jnp.dtype(dtype).itemsize
    return max(8, 32 // itemsize)


def _round_up(x: int, m: int) -> int:
    return ((x + m - 1) // m) * m


def _relu_kernel(x_ref, o_ref):
    # Elementwise max(x, 0) on the current VMEM tile (VPU).
    o_ref[...] = jnp.maximum(x_ref[...], jnp.zeros((), dtype=x_ref.dtype))


def _relu_2d(x2d: jax.Array, *, target_tile_bytes: int, donate_input: bool) -> jax.Array:
    """Run the streaming ReLU kernel on a lane-dense (rows, lanes) slab."""
    rows, lanes = x2d.shape
    dtype = x2d.dtype
    itemsize = jnp.dtype(dtype).itemsize
    sub = _sublane_multiple(dtype)

    # Rows per block so one block is ~target_tile_bytes (multiple of sublane quantum).
    rows_per_block = max(sub, (target_tile_bytes // (lanes * itemsize)) // sub * sub)

    # Pick the step count first so the grid can be balanced across v7x's 2 TCs:
    # even step count when >1, and at least 2 steps whenever rows allow it.
    steps = pl.cdiv(rows, rows_per_block)
    if steps > 1 and steps % 2 == 1:
        steps += 1
    if steps == 1 and rows >= 2 * sub:
        steps = 2

    # tile_rows is either a multiple of the sublane quantum or the full row
    # extent (both legal block shapes); the trailing grid block may be ragged.
    tile_rows = min(rows, _round_up(pl.cdiv(rows, steps), sub))
    grid = (pl.cdiv(rows, tile_rows),)

    return pl.pallas_call(
        _relu_kernel,
        out_shape=jax.ShapeDtypeStruct((rows, lanes), dtype),
        grid_spec=pltpu.PrefetchScalarGridSpec(
            num_scalar_prefetch=0,
            grid=grid,
            in_specs=[pl.BlockSpec((tile_rows, lanes), lambda i: (i, 0))],
            out_specs=pl.BlockSpec((tile_rows, lanes), lambda i: (i, 0)),
        ),
        compiler_params=pltpu.CompilerParams(
            dimension_semantics=("parallel",),
            # 4 live ~4 MiB buffers (double-buffered in + out) ≈ 16 MiB; the
            # 48 MiB limit leaves headroom and fits v5e / v6e / v7x VMEM.
            vmem_limit_bytes=48 * 1024 * 1024,
        ),
        input_output_aliases=({0: 0} if donate_input else {}),
    )(x2d)


def relu(
    x: jax.Array,
    *,
    target_tile_bytes: int = 4 * 1024 * 1024,
    min_bytes_for_kernel: int = 256 * 1024,
    donate_input: bool = False,
) -> jax.Array:
    """Pallas ReLU matching torch.Tensor.relu() semantics (same shape/dtype)."""
    orig_shape = x.shape
    dtype = x.dtype
    total = int(x.size)
    if total == 0:
        return x

    itemsize = jnp.dtype(dtype).itemsize
    sub = _sublane_multiple(dtype)

    # Small-input bypass: pallas_call launch + reshape plumbing costs multiple
    # µs; tiny activations are strictly faster (and fusible) via plain XLA.
    if total * itemsize < min_bytes_for_kernel:
        return jnp.maximum(x, jnp.zeros((), dtype=dtype))

    # Pick the widest lane-dense last dim dividing the element count.
    # First prefer candidates whose row count is also a sublane multiple
    # (most conv activations), then relax to any multiple-of-128 divisor —
    # a full-dim / ragged-trailing block layout is still legal.
    lanes = 0
    for cand in (4096, 2048, 1024, 512, 256, 128):
        if total % cand == 0 and (total // cand) % sub == 0:
            lanes = cand
            break
    if lanes == 0:
        for cand in (4096, 2048, 1024, 512, 256, 128):
            if total % cand == 0:
                lanes = cand
                break

    x_flat = jnp.reshape(x, (-1,))

    if lanes:
        # Zero-copy path: the whole tensor streams through the kernel.
        out2d = _relu_2d(
            jnp.reshape(x_flat, (total // lanes, lanes)),
            target_tile_bytes=target_tile_bytes,
            donate_input=donate_input,
        )
        return jnp.reshape(out2d, orig_shape)

    # Unaligned element count (rare): kernel on the 128-aligned prefix, plain
    # jnp.maximum on the <128-element tail.  No full-tensor pad/slice pass.
    main = (total // 128) * 128
    parts = []
    if main:
        out_main = _relu_2d(
            jnp.reshape(x_flat[:main], (main // 128, 128)),
            target_tile_bytes=target_tile_bytes,
            donate_input=False,
        )
        parts.append(jnp.reshape(out_main, (-1,)))
    tail = x_flat[main:]
    parts.append(jnp.maximum(tail, jnp.zeros((), dtype=dtype)))
    out_flat = parts[0] if len(parts) == 1 else jnp.concatenate(parts)
    return jnp.reshape(out_flat, orig_shape)


if __name__ == "__main__":
    key = jax.random.PRNGKey(0)

    # Primary check: small NCHW activation consistent with a conv net.
    # Force the kernel path (default small-input bypass would skip it).
    x = jax.random.normal(key, (2, 4, 16, 16), dtype=jnp.float32)
    y = jax.block_until_ready(relu(x, min_bytes_for_kernel=0))
    y_ref = jnp.maximum(x, 0.0)
    assert y.shape == x.shape and y.dtype == x.dtype
    assert bool(jnp.all(y == y_ref))

    # Unaligned element count exercises the aligned-prefix + tail path.
    k2 = jax.random.PRNGKey(1)
    x2 = jax.random.normal(k2, (3, 5, 7, 11), dtype=jnp.float32)
    y2 = jax.block_until_ready(relu(x2, min_bytes_for_kernel=0))
    assert bool(jnp.all(y2 == jnp.maximum(x2, 0.0)))

    # bf16 exercises the dtype-aware (16, 128) sublane handling.
    x3 = jax.random.normal(key, (2, 4, 16, 16), dtype=jnp.bfloat16)
    y3 = jax.block_until_ready(relu(x3, min_bytes_for_kernel=0))
    assert y3.dtype == jnp.bfloat16
    assert bool(jnp.all(y3 == jnp.maximum(x3, jnp.bfloat16(0))))

    # Medium activation: exceeds the bypass threshold, exercises the
    # multi-step (megacore-balanced) grid with default settings.
    k4 = jax.random.PRNGKey(2)
    x4 = jax.random.normal(k4, (4, 8, 64, 64), dtype=jnp.float32)
    y4 = jax.block_until_ready(relu(x4))
    assert bool(jnp.all(y4 == jnp.maximum(x4, 0.0)))

    # Tiny input with defaults takes the XLA bypass and must still be correct.
    y5 = jax.block_until_ready(relu(x))
    assert bool(jnp.all(y5 == y_ref))

    print("KERNEL_OK")
</pallas_src>

<mosaic_0001>
module attributes {stable_mosaic.version = 11 : i64} {
  func.func @_relu_kernel(%arg0: i32, %arg1: memref<8x256xf32, #tpu.memory_space<vmem>>, %arg2: memref<8x256xf32, #tpu.memory_space<vmem>>) attributes {dimension_semantics = [#tpu.dimension_semantics<parallel>], iteration_bounds = array<i64: 1>, scalar_prefetch = 0 : i64, scratch_operands = 0 : i64, tpu.core_type = #tpu.core_type<tc>, window_params = [{transform_indices = @transform_0, window_bounds = array<i64: 8, 256>}, {transform_indices = @transform_1, window_bounds = array<i64: 8, 256>}]} {
    %c0 = arith.constant 0 : index
    %c0_0 = arith.constant 0 : index
    %0 = vector.load %arg1[%c0, %c0_0] : memref<8x256xf32, #tpu.memory_space<vmem>>, vector<8x256xf32>
    %cst = arith.constant 0.000000e+00 : f32
    %1 = vector.broadcast %cst : f32 to vector<8x256xf32>
    %2 = arith.maximumf %0, %1 : vector<8x256xf32>
    %c0_1 = arith.constant 0 : index
    %c0_2 = arith.constant 0 : index
    %3 = vector.load %arg2[%c0_1, %c0_2] : memref<8x256xf32, #tpu.memory_space<vmem>>, vector<8x256xf32>
    tpu.vector_store %arg2[%c0_1, %c0_2], %2 {strides = array<i32>} : memref<8x256xf32, #tpu.memory_space<vmem>>, vector<8x256xf32>,
    return
  }
  func.func @transform_0(%arg0: i32) -> (i32, i32) {
    %c0_i32 = arith.constant 0 : i32
    %c0_i32_0 = arith.constant 0 : i32
    return %arg0, %c0_i32 : i32, i32
  }
  func.func @transform_1(%arg0: i32) -> (i32, i32) {
    %c0_i32 = arith.constant 0 : i32
    %c0_i32_0 = arith.constant 0 : i32
    return %arg0, %c0_i32 : i32, i32
  }
}

</mosaic_0001>

<bundles_post_ra>
// kernel: tpu_custom_call.1
= control target key start
LH: loop header
LB: loop body
LE: loop exit
PB: predicated region body
PF: predicated region fallthrough
CT: control target
= control target key end

     0   :  { %6 = vsyncpa [#allocation3], 0  ;;  %s106_s0 = inlined_call_operand.hbm [shape: f32[8,256], index: 0, kind: input, shape index: {}]   ;;  %s107_s1 = inlined_call_operand.hbm [shape: f32[8,256], index: 1, kind: output, shape index: {}]  }
   0x1   :  { %7 = vsyncpa [#allocation4], 0  ;;  %s88_s6 = smov [#allocation2]  }
   0x2   :  { %s14_s7 = sshll.u32 %s88_s6, 4  ;;  %s15_s7 = int_to_ptr.vmem [resolvable:$true] %s14_s7 }
   0x3   :  { %s52_s8 = scalar_lea.vmem %s15_s7, 256  ;;  %p57_p1 = scmp.lt.s32.totalorder %s15_s7, %s15_s7 }
   0x4   :  { %p53_p0 = scmp.ne.s32.totalorder %s15_s7, %s52_s8  ;;  %p58_p2 = scmp.lt.s32.totalorder %s52_s8, %s52_s8 }
   0x6   :  { %p59_p3 = por %p58_p2, %p57_p1 }
   0x8   :  { %p60_p4 = pnand %p59_p3, %p53_p0 }
   0xa   :  { %63 = shalt.err (!%p60_p4)
}
   0xb   :  { %17 = dma.hbm_to_vmem [thread:$0]  %s106_s0, 256, %s15_s7, [#allocation3]  }
   0xc   :  { %84 = dma.done.wait [#allocation3], 256  }
   0xd   :  { %85 = vsyncadd [#allocation3], 4294967040  ;;  %s89_s11 = smov [#allocation5]   ;;  %v21_v0 = vld [vmem:[#allocation2] sm:$0xff]  ;;  %v22_v1 = vld [vmem:[#allocation2 + $0x8] sm:$0xff] }
   0xe   :  { %s33_s12 = sshll.u32 %s89_s11, 4  ;;  %v23_v2 = vmax.f32 %v21_v0, 0.0  ;;  %v24_v3 = vmax.f32 %v22_v1, 0.0  ;;  %s34_s12 = int_to_ptr.vmem [resolvable:$true] %s33_s12 }
   0xf   :  { %s64_s13 = scalar_lea.vmem %s34_s12, 256  ;;  %p69_p6 = scmp.lt.s32.totalorder %s34_s12, %s34_s12 }
  0x10   :  { %25 = vst [vmem:[#allocation5] sm:$0xff] %v23_v2  ;;  %26 = vst [vmem:[#allocation5 + $0x8] sm:$0xff] %v24_v3  ;;  %p65_p5 = scmp.ne.s32.totalorder %s34_s12, %s64_s13  ;;  %p70_p7 = scmp.lt.s32.totalorder %s64_s13, %s64_s13 }
  0x12   :  { %p71_p8 = por %p70_p7, %p69_p6 }
  0x14   :  { %p72_p9 = pnand %p71_p8, %p65_p5 }
  0x16   :  { %75 = shalt.err (!%p72_p9)
}
  0x17   :  { %36 = dma.vmem_to_hbm [thread:$0]  %s34_s12, 256, %s107_s1, [#allocation4]  }
  0x18   :  { %86 = dma.done.wait [#allocation4], 256  }
  0x19   :  { %87 = vsyncadd [#allocation4], 4294967040 }
  0x1a   :  { %40 = vsyncpa [#allocation3], 1 }
  0x1b   :  { %41 = vsyncpa [#allocation4], 1 }

</bundles_post_ra>
